<compile_context>
chip_gen: v5e
topology: v5e:2x2
jax: 0.10.0
libtpu: 0.0.40
codegen_flags: <defaults>
</compile_context>

<pallas_src>
import math

import jax
import jax.numpy as jnp
from jax import lax
from jax.experimental import pallas as pl
from jax.experimental.pallas import tpu as pltpu


def _round_up(x, m):
    return ((x + m - 1) // m) * m


def _const_spec(shape):
    """Full-array block that stays resident across the (single-axis) grid."""
    nd = len(shape)
    return pl.BlockSpec(shape, lambda g: (0,) * nd)


# ------------------------------------------------------------------------------
# forward: embedding row gather via scalar-prefetch DMA (replaces one-hot matmul)
# ------------------------------------------------------------------------------
def _gather_rows_kernel(ids_ref, row_ref, out_ref):
    del ids_ref  # only consumed by the index_maps
    out_ref[...] = row_ref[...]


def _embedding_gather(table, ids):
    """table: (V+1, D) f32 (row 0 = padding zeros), ids: (N,) int32 -> (N, D)."""
    V1, D = table.shape
    N = ids.shape[0]
    out = pl.pallas_call(
        _gather_rows_kernel,
        out_shape=jax.ShapeDtypeStruct((N, 1, D), jnp.float32),
        grid_spec=pltpu.PrefetchScalarGridSpec(
            num_scalar_prefetch=1,
            grid=(N,),
            in_specs=[pl.BlockSpec((1, 1, D), lambda t, ids: (ids[t], 0, 0))],
            out_specs=pl.BlockSpec((1, 1, D), lambda t, ids: (t, 0, 0)),
        ),
        compiler_params=pltpu.CompilerParams(
            dimension_semantics=("arbitrary",)),
    )(ids, table.reshape(V1, 1, D))
    return out.reshape(N, D)


def hide_forward(params, inputs, Hs, mask_item, item):
    """Mirrors HIDE.forward(inputs, Hs, mask_item, item) with disen=False."""
    # TODO(synk): LocalHyperGATlayer / DisentangleGraph are not defined in the
    # provided source, so the local aggregation is identity (h_local = h).  Hs,
    # mask_item and item only feed session_c -> local_agg, which is dead under
    # the identity aggregation, so they are accepted for interface parity only.
    del Hs, mask_item, item
    B, L = inputs.shape
    D = params["embedding"].shape[1]
    item_embeddings = jnp.concatenate(
        [jnp.zeros((1, D), jnp.float32), params["embedding"]], axis=0)

    ids = inputs.reshape(-1).astype(jnp.int32)
    h = _embedding_gather(item_embeddings, ids).reshape(B, L, D)

    output = h                     # h_local = local_agg(h, Hs, session_c) -> identity
    return output, item_embeddings


# ------------------------------------------------------------------------------
# compute_scores, kernel 1: attention / readout -> select (B, D), batch-tiled
# Concatenated matmuls are rewritten as algebraically identical split matmuls
# (cat([a,b],-1) @ W == a @ W[:D] + b @ W[D:]); the (·,1) w_2 matmul is a VPU
# multiply + lane reduce.
# ------------------------------------------------------------------------------
def _select_kernel(hidden_ref, mask_ref, pos_ref,
                   w1a_ref, w1b_ref, wsa_ref, wsb_ref,
                   g1w_ref, g1b_ref, g2w_ref, g2b_ref, g3w_ref, g3b_ref,
                   w2_ref, select_ref):
    f32 = jnp.float32
    hidden = hidden_ref[...]                                   # (TB, L, D)
    mask = mask_ref[...]                                       # (TB, L)
    mask3 = mask[:, :, None]

    # hs = sum(hidden * mask, -2) / sum(mask, 1) ; ht = hidden[:, 0, :]
    hs_vec = jnp.sum(hidden * mask3, axis=1) / jnp.sum(mask, axis=1, keepdims=True)
    ht_vec = hidden[:, 0, :]                                   # (TB, D)

    # nh = tanh(cat([pos, hidden], -1) @ w_1) == tanh(pos @ w1[:D] + hidden @ w1[D:])
    pos_part = jnp.dot(pos_ref[...], w1a_ref[...], preferred_element_type=f32)   # (L, D)
    hid_part = lax.dot_general(hidden, w1b_ref[...], (((2,), (0,)), ((), ())),
                               preferred_element_type=f32)                        # (TB, L, D)
    nh = jnp.tanh(pos_part[None, :, :] + hid_part)

    # hs = cat([hs, ht], -1) @ w_s  (identical for every position within a session)
    hs_tok = (jnp.dot(hs_vec, wsa_ref[...], preferred_element_type=f32)
              + jnp.dot(ht_vec, wsb_ref[...], preferred_element_type=f32))        # (TB, D)
    feat = hs_tok[:, None, :] * hidden                                             # (TB, L, D)

    def lin3(x, w_ref, b_ref):                   # PyTorch Linear: x @ W.T + b
        y = lax.dot_general(x, w_ref[...], (((2,), (1,)), ((), ())),
                            preferred_element_type=f32)
        return y + b_ref[...]

    s1 = jax.nn.sigmoid(lin3(nh, g1w_ref, g1b_ref))                                # (TB, L, D)
    s3 = jax.nn.sigmoid(lin3(feat, g3w_ref, g3b_ref))                              # (TB, L, D)
    s2 = jax.nn.sigmoid(                                                           # (TB, D)
        lax.dot_general(hs_tok, g2w_ref[...], (((1,), (1,)), ((), ())),
                        preferred_element_type=f32) + g2b_ref[...])

    # beta = sigmoid(cat([glu1, glu2, glu3], -1)) @ w_2  -> VPU multiply + lane reduce
    w2 = w2_ref[...]                                                               # (3, D)
    beta = (jnp.sum(s1 * w2[0] + s3 * w2[2], axis=-1)
            + jnp.sum(s2 * w2[1], axis=-1)[:, None])                               # (TB, L)
    beta = beta * mask

    select_ref[...] = jnp.sum(beta[:, :, None] * hidden, axis=1)                   # (TB, D)


def _compute_select(params, hidden, mask):
    B, L, D = hidden.shape
    mask = mask.astype(jnp.float32)
    pos = params["pos_embedding"][:L]
    w1a, w1b = params["w_1"][:D], params["w_1"][D:]
    wsa, wsb = params["w_s"][:D], params["w_s"][D:]
    w2_rows = params["w_2"][:, 0].reshape(3, D)

    TB = 8 if (B % 8 == 0) else B           # batch tile (keeps (8,128) rules happy)
    grid = (B // TB,)

    return pl.pallas_call(
        _select_kernel,
        out_shape=jax.ShapeDtypeStruct((B, D), jnp.float32),
        grid=grid,
        in_specs=[
            pl.BlockSpec((TB, L, D), lambda b: (b, 0, 0)),    # hidden
            pl.BlockSpec((TB, L), lambda b: (b, 0)),          # mask
            _const_spec((L, D)),                              # pos_emb
            _const_spec((D, D)), _const_spec((D, D)),         # w_1 halves
            _const_spec((D, D)), _const_spec((D, D)),         # w_s halves
            _const_spec((D, D)), _const_spec((1, D)),         # glu1 w, b
            _const_spec((D, D)), _const_spec((1, D)),         # glu2 w, b
            _const_spec((D, D)), _const_spec((1, D)),         # glu3 w, b
            _const_spec((3, D)),                              # w_2 rows
        ],
        out_specs=pl.BlockSpec((TB, D), lambda b: (b, 0)),
        compiler_params=pltpu.CompilerParams(
            dimension_semantics=("parallel",)),
    )(hidden, mask, pos, w1a, w1b, wsa, wsb,
      params["glu1_w"], params["glu1_b"],
      params["glu2_w"], params["glu2_b"],
      params["glu3_w"], params["glu3_b"], w2_rows)


# ------------------------------------------------------------------------------
# compute_scores, kernel 2: vocab-tiled scoring matmul against a pre-transposed,
# lane-padded item-embedding table (select @ table_tile).
# ------------------------------------------------------------------------------
def _score_matmul_kernel(select_ref, table_ref, out_ref):
    out_ref[...] = jnp.dot(select_ref[...], table_ref[...],
                           preferred_element_type=jnp.float32)


def compute_scores(params, hidden, mask, item_embeddings, *, tile_v=512):
    B, L, D = hidden.shape
    V = item_embeddings.shape[0] - 1

    select = _compute_select(params, hidden, mask)                         # (B, D)

    # Pre-transpose once in the wrapper (no in-kernel relayout / ds(1, V) slice),
    # drop the padding row, pad vocab to a multiple of the tile (lane-dense stores).
    tile_v = max(128, _round_up(min(tile_v, _round_up(V, 128)), 128))
    V_pad = _round_up(V, tile_v)
    table_t = jnp.pad(item_embeddings[1:].T, ((0, 0), (0, V_pad - V)))     # (D, V_pad)

    scores = pl.pallas_call(
        _score_matmul_kernel,
        out_shape=jax.ShapeDtypeStruct((B, V_pad), jnp.float32),
        grid=(V_pad // tile_v,),
        in_specs=[
            _const_spec((B, D)),                               # select, resident
            pl.BlockSpec((D, tile_v), lambda v: (0, v)),       # pipelined table tile
        ],
        out_specs=pl.BlockSpec((B, tile_v), lambda v: (0, v)),
        compiler_params=pltpu.CompilerParams(
            dimension_semantics=("parallel",),
            vmem_limit_bytes=32 * 1024 * 1024),
    )(select, table_t)
    return scores[:, :V]


# ------------------------------------------------------------------------------
# pure-JAX references (correctness check only)
# ------------------------------------------------------------------------------
def _forward_ref(params, inputs):
    D = params["embedding"].shape[1]
    emb = jnp.concatenate([jnp.zeros((1, D), jnp.float32), params["embedding"]], 0)
    return emb[inputs], emb


def _scores_ref(params, hidden, mask, emb):
    B, L, D = hidden.shape
    m = mask[..., None]
    pos = params["pos_embedding"][:L]
    pos_b = jnp.broadcast_to(pos[None], (B, L, D))
    hs = jnp.sum(hidden * m, -2) / jnp.sum(m, 1)
    hs = jnp.broadcast_to(hs[:, None, :], (B, L, D))
    ht = jnp.broadcast_to(hidden[:, 0:1, :], (B, L, D))
    nh = jnp.tanh(jnp.concatenate([pos_b, hidden], -1) @ params["w_1"])
    hs = jnp.concatenate([hs, ht], -1) @ params["w_s"]
    feat = hs * hidden
    g1 = nh @ params["glu1_w"].T + params["glu1_b"]
    g2 = hs @ params["glu2_w"].T + params["glu2_b"]
    g3 = feat @ params["glu3_w"].T + params["glu3_b"]
    nh2 = jax.nn.sigmoid(jnp.concatenate([g1, g2, g3], -1))
    beta = (nh2 @ params["w_2"]) * m
    select = jnp.sum(beta * hidden, 1)
    return select @ emb[1:].T


if __name__ == "__main__":
    B, L, D, V = 2, 8, 32, 20        # batch, seq, hiddenSize, num_node
    stdv = 1.0 / math.sqrt(D)        # HIDE.reset_parameters: U(-stdv, stdv)
    key = jax.random.PRNGKey(0)
    ks = jax.random.split(key, 16)
    u = lambda k, s: jax.random.uniform(k, s, jnp.float32, -stdv, stdv)

    params = {
        "embedding": u(ks[0], (V, D)),
        "pos_embedding": u(ks[1], (200, D)),
        "w_1": u(ks[2], (2 * D, D)),
        "w_2": u(ks[3], (3 * D, 1)),
        "w_s": u(ks[4], (2 * D, D)),
        "glu1_w": u(ks[5], (D, D)), "glu1_b": u(ks[6], (1, D)),
        "glu2_w": u(ks[7], (D, D)), "glu2_b": u(ks[8], (1, D)),
        "glu3_w": u(ks[9], (D, D)), "glu3_b": u(ks[10], (1, D)),
    }

    # session data: item ids in [1, V], 0 = padding; row 1 has 3 padded positions
    item = jax.random.randint(ks[11], (B, L), 1, V + 1)
    pad = jnp.arange(L)[None, :] >= jnp.array([[L], [L - 3]])
    item = jnp.where(pad, 0, item).astype(jnp.int32)
    inputs = item
    mask_item = (item != 0).astype(jnp.float32)
    Hs = jax.random.uniform(ks[12], (B, L, L))   # hypergraph incidence (unused, see TODO)

    output, item_embeddings = hide_forward(params, inputs, Hs, mask_item, item)
    scores = compute_scores(params, output, mask_item, item_embeddings)
    jax.block_until_ready((output, item_embeddings, scores))

    # verify against pure-JAX reference
    h_ref, emb_ref = _forward_ref(params, inputs)
    sc_ref = _scores_ref(params, h_ref, mask_item, emb_ref)
    assert bool(jnp.allclose(output, h_ref, atol=1e-5)), "forward mismatch"
    assert bool(jnp.allclose(item_embeddings, emb_ref, atol=1e-6)), "embedding mismatch"
    assert bool(jnp.allclose(scores, sc_ref, atol=1e-4)), "scores mismatch"

    print("KERNEL_OK")
</pallas_src>

<mosaic_0001>
module attributes {stable_mosaic.version = 11 : i64} {
  func.func @_gather_rows_kernel(%arg0: i32, %arg1: memref<16xi32, #tpu.memory_space<smem>>, %arg2: memref<1x1x32xf32, #tpu.memory_space<vmem>>, %arg3: memref<1x1x32xf32, #tpu.memory_space<vmem>>) attributes {dimension_semantics = [#tpu.dimension_semantics<arbitrary>], iteration_bounds = array<i64: 16>, scalar_prefetch = 1 : i64, scratch_operands = 0 : i64, tpu.core_type = #tpu.core_type<tc>, window_params = [{transform_indices = @transform_0, window_bounds = array<i64: 1, 1, 32>}, {transform_indices = @transform_1, window_bounds = array<i64: 1, 1, 32>}]} {
    %c0 = arith.constant 0 : index
    %c0_0 = arith.constant 0 : index
    %c0_1 = arith.constant 0 : index
    %0 = vector.load %arg2[%c0, %c0_0, %c0_1] : memref<1x1x32xf32, #tpu.memory_space<vmem>>, vector<1x1x32xf32>
    %c0_2 = arith.constant 0 : index
    %c0_3 = arith.constant 0 : index
    %c0_4 = arith.constant 0 : index
    %1 = vector.load %arg3[%c0_2, %c0_3, %c0_4] : memref<1x1x32xf32, #tpu.memory_space<vmem>>, vector<1x1x32xf32>
    tpu.vector_store %arg3[%c0_2, %c0_3, %c0_4], %0 {strides = array<i32>} : memref<1x1x32xf32, #tpu.memory_space<vmem>>, vector<1x1x32xf32>,
    return
  }
  func.func @transform_0(%arg0: i32, %arg1: memref<16xi32, #tpu.memory_space<smem>>) -> (i32, i32, i32) {
    %0 = arith.index_cast %arg0 : i32 to index
    %1 = memref.load %arg1[%0] : memref<16xi32, #tpu.memory_space<smem>>
    %c0_i32 = arith.constant 0 : i32
    %c0_i32_0 = arith.constant 0 : i32
    %c0_i32_1 = arith.constant 0 : i32
    return %1, %c0_i32, %c0_i32_0 : i32, i32, i32
  }
  func.func @transform_1(%arg0: i32, %arg1: memref<16xi32, #tpu.memory_space<smem>>) -> (i32, i32, i32) {
    %c0_i32 = arith.constant 0 : i32
    %c0_i32_0 = arith.constant 0 : i32
    %c0_i32_1 = arith.constant 0 : i32
    return %arg0, %c0_i32, %c0_i32_0 : i32, i32, i32
  }
}

</mosaic_0001>

<bundles_post_ra>
// kernel: tpu_custom_call.1
= control target key start
LH: loop header
LB: loop body
LE: loop exit
PB: predicated region body
PF: predicated region fallthrough
CT: control target
= control target key end

     0   :  { %s437_s12 = smov [#allocation3]   ;;  %s614_s0 = inlined_call_operand.hbm [shape: s32[16], index: 0, kind: input, shape index: {}]   ;;  %s615_s1 = inlined_call_operand.hbm [shape: f32[21,1,32], index: 1, kind: input, shape index: {}]   ;;  %s616_s2 = inlined_call_operand.hbm [shape: f32[16,1,32], index: 2, kind: output, shape index: {}]  }
   0x1   :  { %s8_s11 = sshll.u32 %s614_s0, 4  ;;  %s9_s11 = int_to_ptr.hbm [resolvable:$true] %s8_s11 }
   0x2   :  { %11 = dma.hbm_to_smem %s9_s11, 16, %s437_s12, [#allocation2] }
   0x3   :  { %399 = dma.done.wait [#allocation2], 16 }
   0x4   :  { %400 = vsyncadd [#allocation2], 4294967280 }
   0x5   :  { %14 = sfence }
   0x6   :  { %15 = vsyncpa [#allocation5], 0 }
   0x7   :  { %17 = vsyncpa [#allocation5 + $0x1], 0 }
   0x8   :  { %18 = vsyncpa [#allocation6], 0 }
   0x9   :  { %20 = vsyncpa [#allocation6 + $0x1], 0  ;;  %s456_s13 = smov 0   ;;  %s458_s14 = smov 0  }
   0xa   :  { %s460_s15 = smov 0   ;;  %s462_s16 = smov 0  }
   0xb   :  { %s464_s17 = smov 0   ;;  %s466_s0 = smov 0  }
   0xc   :  { %s468_s18 = smov 0  }
   0xd LB: > { %s490_s19 = sadd.s32 4294967295, %s435_s18   ;;  %s220_s20 = sadd.s32 4294967294, %s435_s18   ;;  %s435_s18 = sphi %s468_s18, %s631_s18   ;;  %s431_s0 = sphi %s466_s0, %s630_s0   ;;  %s427_s17 = sphi %s464_s17, %s629_s17   ;;  %s423_s16 = sphi %s462_s16, %s628_s16   ;;  %s419_s15 = sphi %s460_s15, %s627_s15   ;;  %s415_s14 = sphi %s458_s14, %s626_s14   ;;  %s411_s13 = sphi %s456_s13, %s625_s13  }
   0xe   : > { %s494_s21 = sadd.s32 1, %s435_s18   ;;  %s30_s22 = sld [smem:[#allocation3 + %s435_s18]] }
   0xf   : > { %s31_s23 = sld [smem:[#allocation3 + %s494_s21]]  ;;  %s35_s24 = sadd.s32 1, %s431_s0 }
  0x10   : > { %p42_p0 = scmp.ne.s32.totalorder %s431_s0, %s427_s17  ;;  %p43_p1 = scmp.eq.s32.totalorder %s435_s18, 0 }
  0x11   : > { %p48_p2 = scmp.ne.s32.totalorder %s427_s17, %s423_s16  ;;  %p49_p3 = scmp.eq.s32.totalorder %s490_s19, 0 }
  0x12   : > { %p504_p4 = por %p43_p1, %p42_p0  ;;  %s58_s26 = ssub.s32 %s435_s18, %s494_s21 }
  0x13   : > { %p510_p5 = por %p49_p3, %p48_p2  ;;  %p59_p6 = scmp.eq.s32.totalorder %s58_s26, 0 }
  0x14   : > { %s61_s28 = sadd.s32 1, %s419_s15  ;;  %p71_p7 = scmp.ne.s32.totalorder %s419_s15, %s415_s14 }
  0x15   : > { %s32_s29 = ssub.s32 %s30_s22, %s31_s23  ;;  %p72_p8 = scmp.eq.s32.totalorder %s490_s19, 15 }
  0x16   : > { %p33_p9 = scmp.eq.s32.totalorder %s32_s29, 0  ;;  %p77_p10 = scmp.ne.s32.totalorder %s415_s14, %s411_s13 }
  0x17   : > { %s521_s30 = scalar_select %p59_p6, %s419_s15, %s61_s28  }
  0x18   : > { %s524_s3 = scalar_select %p33_p9, %s431_s0, %s35_s24  }
  0x19   : > { %p526_p11 = por %p72_p8, %p71_p7  ;;  %p78_p12 = scmp.eq.s32.totalorder %s220_s20, 15 }
  0x1a   : > { %619 = sst [smem:[#allocation13_spill]] %s524_s3  ;;  %p242_p0 = scmp.lt.s32.totalorder %s435_s18, 16 }
  0x1b   : > { %p530_p13 = por %p78_p12, %p77_p10  ;;  %s98_s6 = sand.u32 1, %s431_s0  }
  0x1c   : > { %s226_s7 = scalar_select %p504_p4, [#allocation3], [#allocation8] }
  0x1d   : > { %s227_s8 = scalar_select %p504_p4, %s435_s18, 0 }
  0x1e   : > { %s633_s7 = smov (!%p242_p0, %s226_s7), [#allocation9]  ;;  %p543_p1 = pnand %p242_p0, %p504_p4 }
  0x1f   : > { %s635_s8 = smov (!%p242_p0, %s227_s8), 0  ;;  %p223_p2 = scmp.ge.s32.totalorder %s435_s18, 1 }
  0x20   : > { %s102_s10 = sld [smem:[%s633_s7 + %s635_s8]]  ;;  %p114_p3 = scmp.lt.s32.totalorder %s435_s18, 17 }
  0x21   : > { %s101_s11 = scalar_lea.vmem [#allocation4], %s98_s6  ;;  %s99_s25 = scalar_lea.sflag [#allocation5], %s98_s6 }
  0x22   : > { %s109_s12 = sshll.u32 %s101_s11, 4  ;;  %p549_p6 = pnand %p223_p2, %p114_p3  ;;  %s110_s12 = int_to_ptr.vmem [resolvable:$true] %s109_s12 }
  0x23   : > { %p317_p7 = pneg %p543_p1  ;;  %s320_s8 = scalar_lea.hbm %s615_s1, 21 }
  0x26   : > { %s105_s23 = scalar_lea.hbm %s615_s1, %s102_s10 }
  0x27   : > { %s107_s24 = sshll.u32 %s105_s23, 4  ;;  %s108_s24 = int_to_ptr.hbm [resolvable:$true] %s107_s24 }
  0x28   : > { %s313_s26 = sshra.s32 %s108_s24, 4  ;;  %s314_s26 = int_to_ptr.hbm [resolvable:$true] %s313_s26 }
  0x29   : > { %s315_s28 = scalar_lea.hbm %s314_s26, 1  ;;  %p321_p10 = scmp.lt.s32.totalorder %s314_s26, %s615_s1 }
  0x2a   : > { %p316_p4 = scmp.ne.s32.totalorder %s314_s26, %s315_s28  ;;  %p322_p12 = scmp.lt.s32.totalorder %s320_s8, %s315_s28 }
  0x2c   : > { %p318_p8 = pnand %p317_p7, %p316_p4  ;;  %p323_p0 = por %p322_p12, %p321_p10 }
  0x2e   : > { %p319_p9 = pneg %p318_p8 }
  0x30   : > { %p324_p2 = pnand %p323_p0, %p319_p9 }
  0x32   : > { %327 = shalt.err (!%p324_p2)
}
  0x33   : > { %237 = dma.hbm_to_vmem [thread:$0]  (!%p543_p1), %s108_s24, 16, %s110_s12, %s99_s25  }
  0x34   : > { %118 = sbr.rel (%p549_p6) target bundleno = 73 (0x49), region = 24  ;;  %s120_s6 = sand.u32 (!%p549_p6), 1, %s427_s17  }
  0x35   : > { %s121_s10 = scalar_lea.sflag (!%p549_p6), [#allocation5], %s120_s6  ;;  %s123_s20 = scalar_lea.vmem (!%p549_p6), [#allocation4], %s120_s6 }
  0x39   : > { %402 = dma.done.wait (%p510_p5), %s121_s10, 16  }
  0x3a   : > { %404 = vsyncadd (%p510_p5), %s121_s10, 4294967280  ;;  %s139_s3 = sand.u32 1, %s415_s14   ;;  %s154_s12 = scalar_lea.hbm %s616_s2, %s490_s19  ;;  %vm143_vm0 = vcmask 253952   ;;  %v142_v0 = vld [vmem:[%s123_s20] sm:$0x1] }
  0x3b   : > { %s140_s16 = scalar_lea.vmem [#allocation7], %s139_s3  ;;  %s158_s24 = sshll.u32 %s154_s12, 4  ;;  %s159_s24 = int_to_ptr.hbm [resolvable:$true] %s158_s24 }
  0x3c   : > { %s156_s23 = sshll.u32 %s140_s16, 4  ;;  %144 = vst.msk [vmem:[%s140_s16] sm:$0x1] %vm143_vm0, %v142_v0  ;;  %s146_s25 = scalar_lea.sflag [#allocation6], %s139_s3  ;;  %s157_s23 = int_to_ptr.vmem [resolvable:$true] %s156_s23 }
  0x3d   : > { %s357_s26 = sshra.s32 %s159_s24, 4  ;;  %s363_s19 = scalar_lea.hbm %s616_s2, 16  ;;  %s358_s26 = int_to_ptr.hbm [resolvable:$true] %s357_s26 }
  0x3e   : > { %s359_s27 = scalar_lea.hbm %s358_s26, 1  ;;  %p364_p6 = scmp.lt.s32.totalorder %s358_s26, %s616_s2 }
  0x3f   : > { %p360_p5 = scmp.ne.s32.totalorder %s358_s26, %s359_s27  ;;  %p365_p4 = scmp.lt.s32.totalorder %s363_s19, %s359_s27 }
  0x41   : > { %p361_p1 = pnand %p360_p5, %p526_p11  ;;  %p366_p7 = por %p365_p4, %p364_p6 }
  0x43   : > { %p362_p3 = pneg %p361_p1 }
  0x45   : > { %p367_p8 = pnand %p366_p7, %p362_p3 }
  0x47   : > { %370 = shalt.err (!%p367_p8)
}
  0x48   : > { %230 = dma.vmem_to_hbm [thread:$0]  (%p526_p11), %s157_s23, 16, %s159_s24, %s146_s25  }
  0x49 PF: > { %p243_p9 = scmp.ge.s32.totalorder %s435_s18, 2  ;;  %s170_s11 = sand.u32 1, %s411_s13  }
  0x4a   : > { %s171_s6 = scalar_lea.sflag [#allocation6], %s170_s11 }
  0x4b   : > { %p239_p10 = pnand %p243_p9, %p530_p13 }
  0x4d   : > { %p240_p12 = pneg %p239_p10 }
  0x4f   : > { %406 = dma.done.wait (%p240_p12), %s171_s6, 16  }
  0x50   : > { %408 = vsyncadd (%p240_p12), %s171_s6, 4294967280  ;;  %s624_s4 = sld [smem:[#allocation13_spill]]  ;;  %p23_p11 = scmp.ge.s32.totalorder %s494_s21, 18  }
  0x51   : > { %s625_s13 = smov %s415_s14  ;;  %s626_s14 = smov %s419_s15 }
  0x52   : > { %s627_s15 = smov %s521_s30  ;;  %s628_s16 = smov %s427_s17 }
  0x53   : > { %s629_s17 = smov %s431_s0  ;;  %s631_s18 = smov %s494_s21 }
  0x54   :  { %25 = sbr.rel (!%p23_p11) target bundleno = 13 (0xd), region = 69 }
  0x56   : > { %s630_s0 = smov %s624_s4 }
  0x59   :  { %176 = vsyncpa [#allocation5], 1 }
  0x5a   :  { %178 = vsyncpa [#allocation5 + $0x1], 1 }
  0x5b   :  { %179 = vsyncpa [#allocation6], 1 }
  0x5c   :  { %181 = vsyncpa [#allocation6 + $0x1], 1 }

</bundles_post_ra>
